<compile_context>
chip_gen: v7x
topology: tpu7x:2x2x1
jax: 0.10.0
libtpu: 0.0.40
codegen_flags: <defaults>
</compile_context>

<pallas_src>
import jax
import jax.numpy as jnp
from jax import lax
from jax.experimental import pallas as pl
from jax.experimental.pallas import tpu as pltpu


def qmix_kernel(q_ref, w1t_ref, b1t_ref, wft_ref, bf_ref, out_ref):
    # q_ref   : (TM, S)  streamed batch tile (natural row-major layout)
    # w1t_ref : (H, S)   resident, possibly bf16
    # b1t_ref : (H, 1)   resident, f32
    # wft_ref : (H, 1)   resident fused head+mixer weight column, f32
    # bf_ref  : (1, 1)   fused scalar bias in SMEM, f32
    # out_ref : (1, TM)  lane-dense output row (batch on lanes)
    #
    # out[h, b] = sum_s w1t[h, s] * q[b, s]  -- rhs contracted over its last
    # dim, i.e. the native "q @ k^T" MXU pattern; no transpose materialized.
    xT = lax.dot_general(
        w1t_ref[...], q_ref[...],
        dimension_numbers=(((1,), (1,)), ((), ())),
        preferred_element_type=jnp.float32)                   # (H, TM)
    xT = jnp.maximum(xT + b1t_ref[...], 0.0)                  # ReLU, f32, full-lane VPU
    # Fused agent-heads + mixing layer: contract over H as a sublane reduce;
    # the result (1, TM) is already lane-dense -> unmasked full-lane stores.
    q_total = jnp.sum(xT * wft_ref[...], axis=0, keepdims=True) + bf_ref[0, 0]
    out_ref[...] = q_total.astype(out_ref.dtype)


def _round_up(x, m):
    return ((x + m - 1) // m) * m


def qmix_forward(q_values, w1, b1, w2, b2, w3, b3, *,
                 block_rows=65536, use_bf16=True,
                 min_pallas_batch=4096, force_pallas=False):
    """QMIX forward.  Returns q_total of shape (B, 1), f32."""
    B, S = q_values.shape
    H = w1.shape[1]

    # Fold the per-agent heads and the mixing layer (agent_qs never returned):
    #   (x @ w2 + b2) @ w3 + b3  ==  x @ (w2 @ w3) + (b2 @ w3 + b3)
    wf = (w2 @ w3).astype(jnp.float32)                 # (H, 1) weight column
    bf = (b2 @ w3 + b3).astype(jnp.float32)            # (1, 1) scalar bias

    if (not force_pallas) and B < min_pallas_batch:
        # Tiny RL batches: a single-step pallas_call launch dominates the few
        # microseconds of work; let XLA fuse the folded math instead.
        x = jnp.maximum(q_values.astype(jnp.float32) @ w1 + b1, 0.0)
        return x @ wf + bf

    w1t = jnp.asarray(w1, jnp.float32).T               # (H, S), VMEM-resident
    b1t = jnp.asarray(b1, jnp.float32).T               # (H, 1), VMEM-resident

    if use_bf16:
        # Halves HBM traffic on the streamed input; MXU accumulation stays f32
        # via preferred_element_type, bias/ReLU/reduce stay f32 (v5e-safe).
        q_in = q_values.astype(jnp.bfloat16)
        w1t = w1t.astype(jnp.bfloat16)
    else:
        q_in = q_values.astype(jnp.float32)

    # Batch tile selection:
    #  * small B: one full-extent block (always layout-legal);
    #  * large B: multiple-of-128 tiles (lane-dense output blocks), capped so
    #    the grid has >= 2 steps for megacore sharding on v7x, and at
    #    block_rows so double-buffered tiles stay well inside scoped VMEM
    #    (v5e 16 MiB default, v7x 32 MiB of 64 MiB physical).
    if B <= 256:
        tm = B
    else:
        tm = min(block_rows, max(128, _round_up(pl.cdiv(B, 2), 128)))
    grid = (pl.cdiv(B, tm),)

    in_specs = [
        pl.BlockSpec((tm, S), lambda i: (i, 0)),               # q_values (streamed)
        pl.BlockSpec((H, S), lambda i: (0, 0)),                # w1^T (resident)
        pl.BlockSpec((H, 1), lambda i: (0, 0)),                # b1^T (resident)
        pl.BlockSpec((H, 1), lambda i: (0, 0)),                # fused head column
        pl.BlockSpec(memory_space=pltpu.MemorySpace.SMEM),     # fused scalar bias
    ]
    # Lane-dense output row: batch sits on lanes, unmasked vst writeback.
    out_specs = pl.BlockSpec((1, tm), lambda i: (0, i))

    flops = 2 * B * S * H + 2 * B * H
    bytes_accessed = int(q_in.size * q_in.dtype.itemsize
                         + w1t.size * w1t.dtype.itemsize
                         + 4 * (H + H + 1 + B))
    cost = pl.CostEstimate(flops=flops, transcendentals=0,
                           bytes_accessed=bytes_accessed)

    out = pl.pallas_call(
        qmix_kernel,
        grid=grid,
        in_specs=in_specs,
        out_specs=out_specs,
        out_shape=jax.ShapeDtypeStruct((1, B), jnp.float32),
        compiler_params=pltpu.CompilerParams(
            dimension_semantics=("parallel",)),   # megacore on v7x
        cost_estimate=cost,
    )(q_in, w1t, b1t, wf, bf)

    # (1, B) -> (B, 1): pure metadata reshape (no data movement).
    return out.reshape(B, 1)


def init_params(key, state_dim, num_agents, hidden_dim):
    """Deterministic PyTorch-Linear-style init (uniform +/- 1/sqrt(fan_in))."""
    ks = jax.random.split(key, 6)

    def unif(k, shape, fan_in):
        bound = 1.0 / jnp.sqrt(jnp.float32(fan_in))
        return jax.random.uniform(k, shape, jnp.float32, -bound, bound)

    # input_layer: Linear(state_dim -> hidden_dim); weight stored transposed.
    w1 = unif(ks[0], (state_dim, hidden_dim), state_dim)
    b1 = unif(ks[1], (1, hidden_dim), state_dim)
    # q_layers: num_agents x Linear(hidden_dim -> 1), fused into (H, A).
    w2 = unif(ks[2], (hidden_dim, num_agents), hidden_dim)
    b2 = unif(ks[3], (1, num_agents), hidden_dim)
    # output_layer: Linear(num_agents -> 1); weight stored transposed.
    w3 = unif(ks[4], (num_agents, 1), num_agents)
    b3 = unif(ks[5], (1, 1), num_agents)
    return w1, b1, w2, b2, w3, b3


if __name__ == "__main__":
    batch = 8
    state_dim = 16
    num_agents = 4
    hidden_dim = 32

    key = jax.random.PRNGKey(0)
    k_in, k_p = jax.random.split(key)
    q_values = jax.random.normal(k_in, (batch, state_dim), jnp.float32)
    params = init_params(k_p, state_dim, num_agents, hidden_dim)
    w1, b1, w2, b2, w3, b3 = params

    # Pure-JAX reference of the un-folded PyTorch math.
    x_ref = jnp.maximum(q_values @ w1 + b1, 0.0)
    ref = (x_ref @ w2 + b2) @ w3 + b3

    # f32 kernel path: exact check.
    out_f32 = qmix_forward(q_values, *params, use_bf16=False, force_pallas=True)
    out_f32 = jax.block_until_ready(out_f32)
    assert out_f32.shape == (batch, 1)
    assert jnp.allclose(out_f32, ref, atol=1e-5, rtol=1e-5)

    # Default bf16-streaming kernel path: looser tolerance (bf16 inputs).
    out_bf16 = qmix_forward(q_values, *params, force_pallas=True)
    out_bf16 = jax.block_until_ready(out_bf16)
    assert out_bf16.shape == (batch, 1)
    assert jnp.allclose(out_bf16, ref, atol=5e-2, rtol=5e-2)

    # Small-batch XLA fallback path (no Pallas launch for tiny RL batches).
    out_xla = jax.block_until_ready(qmix_forward(q_values, *params, use_bf16=False))
    assert jnp.allclose(out_xla, ref, atol=1e-5, rtol=1e-5)

    print("KERNEL_OK")
</pallas_src>

<mosaic_0001>
module attributes {stable_mosaic.version = 11 : i64} {
  func.func @qmix_kernel(%arg0: i32, %arg1: memref<8x16xf32, #tpu.memory_space<vmem>>, %arg2: memref<32x16xf32, #tpu.memory_space<vmem>>, %arg3: memref<32x1xf32, #tpu.memory_space<vmem>>, %arg4: memref<32x1xf32, #tpu.memory_space<vmem>>, %arg5: memref<1x1xf32, #tpu.memory_space<smem>>, %arg6: memref<1x8xf32, #tpu.memory_space<vmem>>) attributes {dimension_semantics = [#tpu.dimension_semantics<parallel>], iteration_bounds = array<i64: 1>, scalar_prefetch = 0 : i64, scratch_operands = 0 : i64, tpu.core_type = #tpu.core_type<tc>, window_params = [{transform_indices = @transform_0, window_bounds = array<i64: 8, 16>}, {pipeline_mode = #tpu.pipeline_mode<synchronous>, transform_indices = @transform_1, window_bounds = array<i64: 32, 16>}, {pipeline_mode = #tpu.pipeline_mode<synchronous>, transform_indices = @transform_2, window_bounds = array<i64: 32, 1>}, {pipeline_mode = #tpu.pipeline_mode<synchronous>, transform_indices = @transform_3, window_bounds = array<i64: 32, 1>}, {transform_indices = @transform_4, window_bounds = array<i64: 1, 1>}, {transform_indices = @transform_5, window_bounds = array<i64: 1, 8>}]} {
    %c0 = arith.constant 0 : index
    %c0_0 = arith.constant 0 : index
    %0 = vector.load %arg2[%c0, %c0_0] : memref<32x16xf32, #tpu.memory_space<vmem>>, vector<32x16xf32>
    %c0_1 = arith.constant 0 : index
    %c0_2 = arith.constant 0 : index
    %1 = vector.load %arg1[%c0_1, %c0_2] : memref<8x16xf32, #tpu.memory_space<vmem>>, vector<8x16xf32>
    %cst = arith.constant dense<0.000000e+00> : vector<32x8xf32>
    %2 = tpu.matmul %0, %1, %cst {dimension_numbers = #tpu.dot_dimension_numbers<[1], [1], [0], [0], [0, 0, 1, 0], [], []>} : vector<32x16xf32>, vector<8x16xf32>, vector<32x8xf32> -> vector<32x8xf32>
    %c0_3 = arith.constant 0 : index
    %c0_4 = arith.constant 0 : index
    %3 = vector.load %arg3[%c0_3, %c0_4] : memref<32x1xf32, #tpu.memory_space<vmem>>, vector<32x1xf32>
    %4 = vector.broadcast %3 : vector<32x1xf32> to vector<32x8xf32>
    %5 = arith.addf %2, %4 : vector<32x8xf32>
    %cst_5 = arith.constant 0.000000e+00 : f32
    %6 = vector.broadcast %cst_5 : f32 to vector<32x8xf32>
    %7 = arith.maximumf %5, %6 : vector<32x8xf32>
    %c0_6 = arith.constant 0 : index
    %c0_7 = arith.constant 0 : index
    %8 = vector.load %arg4[%c0_6, %c0_7] : memref<32x1xf32, #tpu.memory_space<vmem>>, vector<32x1xf32>
    %9 = vector.broadcast %8 : vector<32x1xf32> to vector<32x8xf32>
    %10 = arith.mulf %7, %9 : vector<32x8xf32>
    %cst_8 = arith.constant dense<0.000000e+00> : vector<8xf32>
    %11 = vector.multi_reduction <add>, %10, %cst_8 [0] : vector<32x8xf32> to vector<8xf32>
    %12 = vector.shape_cast %11 : vector<8xf32> to vector<1x8xf32>
    %c0_9 = arith.constant 0 : index
    %c0_10 = arith.constant 0 : index
    %13 = memref.load %arg5[%c0_9, %c0_10] : memref<1x1xf32, #tpu.memory_space<smem>>
    %14 = vector.broadcast %13 : f32 to vector<1x8xf32>
    %15 = arith.addf %12, %14 : vector<1x8xf32>
    %c0_11 = arith.constant 0 : index
    %c0_12 = arith.constant 0 : index
    %16 = vector.load %arg6[%c0_11, %c0_12] : memref<1x8xf32, #tpu.memory_space<vmem>>, vector<1x8xf32>
    tpu.vector_store %arg6[%c0_11, %c0_12], %15 {strides = array<i32>} : memref<1x8xf32, #tpu.memory_space<vmem>>, vector<1x8xf32>,
    return
  }
  func.func @transform_0(%arg0: i32) -> (i32, i32) {
    %c0_i32 = arith.constant 0 : i32
    %c0_i32_0 = arith.constant 0 : i32
    return %arg0, %c0_i32 : i32, i32
  }
  func.func @transform_1(%arg0: i32) -> (i32, i32) {
    %c0_i32 = arith.constant 0 : i32
    %c0_i32_0 = arith.constant 0 : i32
    %c0_i32_1 = arith.constant 0 : i32
    return %c0_i32, %c0_i32_0 : i32, i32
  }
  func.func @transform_2(%arg0: i32) -> (i32, i32) {
    %c0_i32 = arith.constant 0 : i32
    %c0_i32_0 = arith.constant 0 : i32
    %c0_i32_1 = arith.constant 0 : i32
    return %c0_i32, %c0_i32_0 : i32, i32
  }
  func.func @transform_3(%arg0: i32) -> (i32, i32) {
    %c0_i32 = arith.constant 0 : i32
    %c0_i32_0 = arith.constant 0 : i32
    %c0_i32_1 = arith.constant 0 : i32
    return %c0_i32, %c0_i32_0 : i32, i32
  }
  func.func @transform_4(%arg0: i32) -> (i32, i32) {
    %c0_i32 = arith.constant 0 : i32
    %c0_i32_0 = arith.constant 0 : i32
    %c0_i32_1 = arith.constant 0 : i32
    return %c0_i32, %c0_i32_0 : i32, i32
  }
  func.func @transform_5(%arg0: i32) -> (i32, i32) {
    %c0_i32 = arith.constant 0 : i32
    %c0_i32_0 = arith.constant 0 : i32
    return %c0_i32, %arg0 : i32, i32
  }
}

</mosaic_0001>

<bundles_post_ra>
// kernel: tpu_custom_call.1
= control target key start
LH: loop header
LB: loop body
LE: loop exit
PB: predicated region body
PF: predicated region fallthrough
CT: control target
= control target key end

     0   :  { %vm51_vm0 = vcmask 130048   ;;  %v265_v7 = vmov 0   ;;  %s359_s0 = inlined_call_operand.vmem [shape: f32[8,16], index: 0, kind: input, shape index: {}]   ;;  %s360_s1 = inlined_call_operand.vmem [shape: f32[32,16], index: 1, kind: input, shape index: {}]   ;;  %s361_s2 = inlined_call_operand.vmem [shape: f32[32,1], index: 2, kind: input, shape index: {}]   ;;  %s362_s3 = inlined_call_operand.vmem [shape: f32[32,1], index: 3, kind: input, shape index: {}]   ;;  %s363_s4 = inlined_call_operand.<no memory space> [shape: f32[1,1], index: 4, kind: input, shape index: {}]   ;;  %s364_s5 = inlined_call_operand.hbm [shape: f32[1,8], index: 5, kind: output, shape index: {}]  }
   0x1   :  { %v26_v0 = vld [vmem:[%s359_s0] sm:$0xff]  ;;  %v24_v2 = vld [vmem:[%s360_s1 + $0x10] sm:$0xff]  ;;  %v23_v3 = vld [vmem:[%s360_s1 + $0x8] sm:$0xff]  ;;  %239 = vset.pattern.permute.xlu0 %v265_v7  ;;  %240 = vset.pattern.permute.xlu1 %v265_v7 }
   0x2   :  { %v22_v1 = vld [vmem:[%s360_s1] sm:$0xff]  ;;  %227 = vmatprep.subr.msk.mxu0 %vm51_vm0, %v26_v0  ;;  %235 = vmatprep.subr.msk.mxu1 %vm51_vm0, %v26_v0  ;;  %v25_v4 = vld [vmem:[%s360_s1 + $0x18] sm:$0xff]  ;;  %v29_v6 = vld [vmem:[%s361_s2 + $0x10] sm:$0xff] }
   0x3   :  { %228 = vmatpush3.xpose.msk.msra.mxu0 %vm51_vm0, %v26_v0  ;;  %236 = vmatpush3.xpose.msk.msra.mxu1 %vm51_vm0, %v26_v0  ;;  %v27_v5 = vld [vmem:[%s361_s2] sm:$0xff] }
   0x4   :  { %229 = vmatprep.mubr.msk.f32.mxu0 %vm51_vm0, %v22_v1  ;;  %232 = vmatprep.mubr.msk.f32.mxu1 %vm51_vm0, %v24_v2 }
   0x5   :  { %11 = vsyncpa [#allocation4], 0  ;;  %33 = vperm.xlu0 %239, %v27_v5   ;;  %43 = vperm.xlu1 %240, %v29_v6   ;;  %v28_v8 = vld [vmem:[%s361_s2 + $0x8] sm:$0xff]  ;;  %v30_v9 = vld [vmem:[%s361_s2 + $0x18] sm:$0xff]  ;;  %vm184_vm1 = vcmask 64512   ;;  %v199_v50 = vstv %s363_s4  ;;  %s266_s17 = smov [#allocation3]  }
   0x6   :  { %230 = vmatmul.mubr.msk.f32.vlgmr.msra.gmra.mrb[0].mxu0 %vm51_vm0, %v23_v3  ;;  %233 = vmatmul.mubr.msk.f32.vlgmr.msra.gmra.mrb[0].mxu1 %vm51_vm0, %v25_v4  ;;  %v156_v10 = vld [vmem:[%s362_s3] sm:$0xff]  ;;  %v157_v11 = vld [vmem:[%s362_s3 + $0x8] sm:$0xff]  ;;  %v158_v12 = vld [vmem:[%s362_s3 + $0x10] sm:$0xff]  ;;  %s209_s18 = sshll.u32 %s266_s17, 4  ;;  %vm201_vm2 = vcmask 57344   ;;  %s210_s18 = int_to_ptr.vmem [resolvable:$true] %s209_s18 }
   0x7   :  { %v159_v13 = vld [vmem:[%s362_s3 + $0x18] sm:$0xff]  ;;  %s241_s19 = scalar_lea.vmem %s210_s18, 16  ;;  %s245_s20 = scalar_lea.vmem %s210_s18, 32 }
   0x8   :  { %p242_p0 = scmp.ne.s32.totalorder %s210_s18, %s241_s19  ;;  %p246_p1 = scmp.lt.s32.totalorder %s210_s18, %s210_s18 }
   0x9   :  { %38 = vperm.xlu0 %239, %v28_v8   ;;  %48 = vperm.xlu1 %240, %v30_v9   ;;  %p247_p2 = scmp.lt.s32.totalorder %s245_s20, %s241_s19 }
   0xb   :  { %p248_p3 = por %p247_p2, %p246_p1 }
   0xd   :  { %162 = vperm.xlu0 %239, %v156_v10   ;;  %167 = vperm.xlu1 %240, %v157_v11   ;;  %p249_p4 = pnand %p248_p3, %p242_p0 }
  0x11   :  { %172 = vperm.xlu0 %239, %v158_v12   ;;  %177 = vperm.xlu1 %240, %v159_v13  }
  0x84   :  { %v34_v14 = vpop.permute.xlu0 %33  ;;  %v44_v15 = vpop.permute.xlu1 %43 }
  0x88   :  { %v39_v16 = vpop.permute.xlu0 %38  ;;  %v49_v17 = vpop.permute.xlu1 %48 }
  0x8c   :  { %v163_v18 = vpop.permute.xlu0 %162  ;;  %v168_v19 = vpop.permute.xlu1 %167 }
  0x90   :  { %v173_v32 = vpop.permute.xlu0 %172  ;;  %v178_v36 = vpop.permute.xlu1 %177 }
  0xd9   :  { %v231_v20 = vpop.f32.mrb[0].mxu0  ;;  %v234_v21 = vpop.f32.mrb[0].mxu1 }
  0xda   :  { %v139_v22 = vadd.f32 %v231_v20, %v39_v16  ;;  %v149_v23 = vadd.f32 %v234_v21, %v49_v17  ;;  %v133_v24 = vpop.f32.mrb[1].mxu0  ;;  %v143_v25 = vpop.f32.mrb[1].mxu1 }
  0xdb   :  { %v134_v26 = vadd.f32 %v133_v24, %v34_v14  ;;  %v144_v27 = vadd.f32 %v143_v25, %v44_v15 }
  0xdc   :  { %v153_v28 = vmax.f32 %v139_v22, 0.0  ;;  %v155_v29 = vmax.f32 %v149_v23, 0.0 }
  0xdd   :  { %v152_v30 = vmax.f32 %v134_v26, 0.0  ;;  %v154_v31 = vmax.f32 %v144_v27, 0.0 }
  0xde   :  { %v181_v33 = vmul.f32 %v168_v19, %v153_v28  ;;  %v183_v38 = vmul.f32 %v178_v36, %v155_v29 }
  0xdf   :  { %v180_v34 = vmul.f32 %v163_v18, %v152_v30  ;;  %v182_v35 = vmul.f32 %v173_v32, %v154_v31 }
  0xe0   :  { %v186_v37 = vsel %vm184_vm1, %v181_v33, 0.0  ;;  %v190_v43 = vsel %vm184_vm1, %v183_v38, 0.0 }
  0xe1   :  { %v185_v39 = vsel %vm184_vm1, %v180_v34, 0.0  ;;  %v188_v41 = vsel %vm184_vm1, %v182_v35, 0.0 }
  0xe2   :  { %v187_v40 = vadd.f32 %v186_v37, %v185_v39 }
  0xe4   :  { %v189_v42 = vadd.f32 %v188_v41, %v187_v40 }
  0xe6   :  { %v191_v44 = vadd.f32 %v190_v43, %v189_v42 }
  0xe8   :  { %v192_v45 = vrot.slane %v191_v44, 4 }
  0xea   :  { %v193_v46 = vadd.f32 %v192_v45, %v191_v44 }
  0xec   :  { %v194_v47 = vrot.slane %v193_v46, 2 }
  0xee   :  { %v195_v48 = vadd.f32 %v194_v47, %v193_v46 }
  0xf0   :  { %v196_v49 = vrot.slane %v195_v48, 1 }
  0xf2   :  { %v197_v51 = vadd.f32 %v196_v49, %v195_v48 }
  0xf4   :  { %v200_v52 = vadd.f32 %v199_v50, %v197_v51 }
  0xf6   :  { %202 = vst.msk [vmem:[#allocation3] sm:$0x1] %vm201_vm2, %v200_v52 }
  0xf7   :  { %252 = shalt.err (!%p249_p4)
}
  0xf8   :  { %s253_s23 = scalar_lea.hbm %s364_s5, 16 }
  0xf9   :  { %p254_p5 = scmp.ne.s32.totalorder %s364_s5, %s253_s23  ;;  %p257_p6 = scmp.lt.u32.totalorder %s253_s23, %s364_s5 }
  0xfb   :  { %p259_p7 = pnand %p257_p6, %p254_p5 }
  0xfd   :  { %262 = shalt.err (!%p259_p7)
}
  0xfe   :  { %212 = dma.vmem_to_hbm [thread:$0]  %s210_s18, 16, %s364_s5, [#allocation4]  }
  0xff   :  { %263 = dma.done.wait [#allocation4], 16  }
 0x100   :  { %264 = vsyncadd [#allocation4], 4294967280 }
 0x101   :  { %216 = vsyncpa [#allocation4], 1 }

</bundles_post_ra>
